<compile_context>
chip_gen: v7x
topology: tpu7x:2x2x1
jax: 0.10.0
libtpu: 0.0.40
codegen_flags: <defaults>
</compile_context>

<pallas_src>
import jax
import jax.numpy as jnp
from jax.experimental import pallas as pl
from jax.experimental.pallas import tpu as pltpu


def _gelu_kernel(x_ref, o_ref):
    # exact GELU: x * 0.5 * (1 + erf(x / sqrt(2))), computed in f32
    x = x_ref[...].astype(jnp.float32)
    inv_sqrt2 = jnp.float32(0.7071067811865476)
    y = x * 0.5 * (1.0 + jax.lax.erf(x * inv_sqrt2))
    o_ref[...] = y.astype(o_ref.dtype)


_TARGET_BLOCK_BYTES = 8 * 1024 * 1024   # ~8 MiB/block -> ~32 MiB double-buffered
_VMEM_LIMIT_BYTES = 48 * 1024 * 1024    # under v7x's 64 MiB physical VMEM


def _run_gelu_2d(x2d: jax.Array) -> jax.Array:
    """Run the GELU kernel over a lane-dense (rows, cols) view."""
    rows, cols = x2d.shape
    dtype = x2d.dtype
    itemsize = jnp.dtype(dtype).itemsize

    # Sublane alignment for packed sub-32-bit dtypes (f32: 8, bf16: 16, i8: 32).
    sub_align = 8 * max(1, 4 // itemsize)

    target_rows = max(sub_align, _TARGET_BLOCK_BYTES // (cols * itemsize))
    target_rows = (target_rows // sub_align) * sub_align

    if rows > target_rows:
        block_rows = target_rows
    elif rows >= 2 * sub_align:
        # Keep >= 2 grid steps so both v7x TensorCores get work.
        half = -(-rows // 2)
        block_rows = -(-half // sub_align) * sub_align
    else:
        block_rows = rows  # full-extent block (allowed even if not 8-aligned)

    grid = (pl.cdiv(rows, block_rows),)

    n = rows * cols
    cost = pl.CostEstimate(
        flops=10 * n,
        transcendentals=0,
        bytes_accessed=2 * n * itemsize,
    )

    return pl.pallas_call(
        _gelu_kernel,
        out_shape=jax.ShapeDtypeStruct((rows, cols), dtype),
        grid_spec=pltpu.PrefetchScalarGridSpec(
            num_scalar_prefetch=0,
            grid=grid,
            in_specs=[pl.BlockSpec((block_rows, cols), lambda i: (i, 0))],
            out_specs=pl.BlockSpec((block_rows, cols), lambda i: (i, 0)),
        ),
        compiler_params=pltpu.CompilerParams(
            dimension_semantics=("parallel",),
            vmem_limit_bytes=_VMEM_LIMIT_BYTES,
        ),
        cost_estimate=cost,
    )(x2d)


def gelu_pallas(x: jax.Array) -> jax.Array:
    """Exact GELU over an arbitrarily-shaped array via a tiled Pallas kernel."""
    orig_shape = x.shape
    n = x.size
    if n == 0:
        return x

    x_flat = x.reshape(-1)

    # Common case: pick a lane-dense column width that divides n exactly
    # (no pad / slice copies anywhere).
    cols = None
    for c in (1024, 512, 256, 128):
        if n % c == 0:
            cols = c
            break
    if cols is not None:
        out = _run_gelu_2d(x_flat.reshape(n // cols, cols))
        return out.reshape(orig_shape)

    # Awkward sizes: stream the 128-aligned prefix through the kernel and
    # compute the tiny (<128 elem) tail with exact GELU in plain JAX.  This
    # avoids full-array pad + slice round trips on a memory-bound op.
    n_main = (n // 128) * 128
    if n_main == 0:
        # Sub-vreg input: single full-extent block.
        out = _run_gelu_2d(x_flat.reshape(1, n))
        return out.reshape(orig_shape)

    for c in (1024, 512, 256, 128):
        if n_main % c == 0:
            cols = c
            break
    main = _run_gelu_2d(x_flat[:n_main].reshape(n_main // cols, cols)).reshape(-1)
    tail = jax.nn.gelu(x_flat[n_main:], approximate=False).astype(x.dtype)
    return jnp.concatenate([main, tail]).reshape(orig_shape)


if __name__ == "__main__":
    key = jax.random.PRNGKey(0)
    # NCHW input consistent with typical PyTorch usage
    x = jax.random.normal(key, (2, 4, 16, 16), dtype=jnp.float32)

    y = gelu_pallas(x)
    jax.block_until_ready(y)

    # sanity-check against plain JAX exact GELU
    y_ref = jax.nn.gelu(x, approximate=False)
    assert y.shape == x.shape and y.dtype == x.dtype
    assert jnp.allclose(y, y_ref, atol=1e-5, rtol=1e-5), "mismatch vs reference"

    print("KERNEL_OK")
</pallas_src>

<mosaic_0001>
module attributes {stable_mosaic.version = 11 : i64} {
  func.func @_gelu_kernel(%arg0: i32, %arg1: memref<2x1024xf32, #tpu.memory_space<vmem>>, %arg2: memref<2x1024xf32, #tpu.memory_space<vmem>>) attributes {dimension_semantics = [#tpu.dimension_semantics<parallel>], iteration_bounds = array<i64: 1>, scalar_prefetch = 0 : i64, scratch_operands = 0 : i64, tpu.core_type = #tpu.core_type<tc>, window_params = [{transform_indices = @transform_0, window_bounds = array<i64: 2, 1024>}, {transform_indices = @transform_1, window_bounds = array<i64: 2, 1024>}]} {
    %c0 = arith.constant 0 : index
    %c0_0 = arith.constant 0 : index
    %0 = vector.load %arg1[%c0, %c0_0] : memref<2x1024xf32, #tpu.memory_space<vmem>>, vector<2x1024xf32>
    %cst = arith.constant 5.000000e-01 : f32
    %1 = vector.broadcast %cst : f32 to vector<2x1024xf32>
    %2 = arith.mulf %0, %1 : vector<2x1024xf32>
    %cst_1 = arith.constant 0.707106769 : f32
    %3 = vector.broadcast %cst_1 : f32 to vector<2x1024xf32>
    %4 = arith.mulf %0, %3 : vector<2x1024xf32>
    %5 = math.erf %4 : vector<2x1024xf32>
    %cst_2 = arith.constant 1.000000e+00 : f32
    %6 = vector.broadcast %cst_2 : f32 to vector<2x1024xf32>
    %7 = arith.addf %6, %5 : vector<2x1024xf32>
    %8 = arith.mulf %2, %7 : vector<2x1024xf32>
    %c0_3 = arith.constant 0 : index
    %c0_4 = arith.constant 0 : index
    %9 = vector.load %arg2[%c0_3, %c0_4] : memref<2x1024xf32, #tpu.memory_space<vmem>>, vector<2x1024xf32>
    tpu.vector_store %arg2[%c0_3, %c0_4], %8 {strides = array<i32>} : memref<2x1024xf32, #tpu.memory_space<vmem>>, vector<2x1024xf32>,
    return
  }
  func.func @transform_0(%arg0: i32) -> (i32, i32) {
    %c0_i32 = arith.constant 0 : i32
    %c0_i32_0 = arith.constant 0 : i32
    return %arg0, %c0_i32 : i32, i32
  }
  func.func @transform_1(%arg0: i32) -> (i32, i32) {
    %c0_i32 = arith.constant 0 : i32
    %c0_i32_0 = arith.constant 0 : i32
    return %arg0, %c0_i32 : i32, i32
  }
}

</mosaic_0001>

<bundles_post_ra>
// kernel: tpu_custom_call.1
= control target key start
LH: loop header
LB: loop body
LE: loop exit
PB: predicated region body
PF: predicated region fallthrough
CT: control target
= control target key end

     0   :  { %6 = vsyncpa [#allocation3], 0  ;;  %s140_s0 = inlined_call_operand.hbm [shape: f32[2,1024], index: 0, kind: input, shape index: {}]   ;;  %s141_s1 = inlined_call_operand.hbm [shape: f32[2,1024], index: 1, kind: output, shape index: {}]  }
   0x1   :  { %7 = vsyncpa [#allocation4], 0  ;;  %s104_s6 = smov [#allocation2]   ;;  %s56_s10 = scalar_lea.hbm %s140_s0, 256 }
   0x2   :  { %s14_s7 = sshll.u32 %s104_s6, 4  ;;  %p57_p0 = scmp.ne.s32.totalorder %s140_s0, %s56_s10  ;;  %s15_s7 = int_to_ptr.vmem [resolvable:$true] %s14_s7 }
   0x3   :  { %p60_p1 = scmp.lt.u32.totalorder %s56_s10, %s140_s0 }
   0x5   :  { %p62_p2 = pnand %p60_p1, %p57_p0 }
   0x7   :  { %65 = shalt.err (!%p62_p2)
}
   0x8   :  { %s66_s15 = scalar_lea.vmem %s15_s7, 256  ;;  %p71_p4 = scmp.lt.s32.totalorder %s15_s7, %s15_s7 }
   0x9   :  { %p67_p3 = scmp.ne.s32.totalorder %s15_s7, %s66_s15  ;;  %p72_p5 = scmp.lt.s32.totalorder %s66_s15, %s66_s15 }
   0xb   :  { %p73_p6 = por %p72_p5, %p71_p4 }
   0xd   :  { %p74_p7 = pnand %p73_p6, %p67_p3 }
   0xf   :  { %77 = shalt.err (!%p74_p7)
}
  0x10   :  { %17 = dma.hbm_to_vmem [thread:$0]  %s140_s0, 256, %s15_s7, [#allocation3]  }
  0x11   :  { %100 = dma.done.wait [#allocation3], 256  }
  0x12   :  { %101 = vsyncadd [#allocation3], 4294967040  ;;  %v21_v0 = vld [vmem:[#allocation2] sm:$0xff]  ;;  %v22_v1 = vld [vmem:[#allocation2 + $0x8] sm:$0xff]  ;;  %s105_s18 = smov [#allocation5]  }
  0x13   :  { %v25_v2 = vmul.f32 0.70710677, %v21_v0  ;;  %v26_v3 = vmul.f32 0.70710677, %v22_v1  ;;  %v23_v4 = vmul.f32 0.5, %v21_v0  ;;  %v24_v6 = vmul.f32 0.5, %v22_v1 }
  0x14   :  { %s41_s19 = sshll.u32 %s105_s18, 4  ;;  %s42_s19 = int_to_ptr.vmem [resolvable:$true] %s41_s19 }
  0x15   :  { %52 = verf.f32 %v25_v2  ;;  %s78_s0 = scalar_lea.vmem %s42_s19, 256  ;;  %p83_p9 = scmp.lt.s32.totalorder %s42_s19, %s42_s19 }
  0x16   :  { %54 = verf.f32 %v26_v3  ;;  %p79_p8 = scmp.ne.s32.totalorder %s42_s19, %s78_s0  ;;  %p84_p10 = scmp.lt.s32.totalorder %s78_s0, %s78_s0 }
  0x18   :  { %p85_p11 = por %p84_p10, %p83_p9 }
  0x1a   :  { %p86_p12 = pnand %p85_p11, %p79_p8 }
  0x1f   :  { %v53_v5 = vpop.eup %52 }
  0x20   :  { %v55_v7 = vpop.eup %54  ;;  %v29_v8 = vadd.f32 1.0, %v53_v5 }
  0x21   :  { %v30_v9 = vadd.f32 1.0, %v55_v7 }
  0x22   :  { %v31_v10 = vmul.f32 %v29_v8, %v23_v4 }
  0x23   :  { %v32_v11 = vmul.f32 %v30_v9, %v24_v6 }
  0x24   :  { %33 = vst [vmem:[#allocation5] sm:$0xff] %v31_v10 }
  0x25   :  { %34 = vst [vmem:[#allocation5 + $0x8] sm:$0xff] %v32_v11 }
  0x26   :  { %89 = shalt.err (!%p86_p12)
}
  0x27   :  { %s90_s22 = scalar_lea.hbm %s141_s1, 256 }
  0x28   :  { %p91_p13 = scmp.ne.s32.totalorder %s141_s1, %s90_s22  ;;  %p94_p0 = scmp.lt.u32.totalorder %s90_s22, %s141_s1 }
  0x2a   :  { %p96_p1 = pnand %p94_p0, %p91_p13 }
  0x2c   :  { %99 = shalt.err (!%p96_p1)
}
  0x2d   :  { %44 = dma.vmem_to_hbm [thread:$0]  %s42_s19, 256, %s141_s1, [#allocation4]  }
  0x2e   :  { %102 = dma.done.wait [#allocation4], 256  }
  0x2f   :  { %103 = vsyncadd [#allocation4], 4294967040 }
  0x30   :  { %48 = vsyncpa [#allocation3], 1 }
  0x31   :  { %49 = vsyncpa [#allocation4], 1 }

</bundles_post_ra>
